<compile_context>
chip_gen: v7x
topology: tpu7x:2x2x1
jax: 0.10.0
libtpu: 0.0.40
codegen_flags: <defaults>
</compile_context>

<pallas_src>
import jax
import jax.numpy as jnp
from jax.experimental import pallas as pl
from jax.experimental.pallas import tpu as pltpu


# ------------------------------ Pallas kernel --------------------------------

def _sse_kernel(x_ref, w_ref, b_ref, o_ref):
    # x_ref: (C, TL)  activations, channels on sublanes, pixels on lanes
    # w_ref: (C, 1)   1x1-conv weight (one scalar per input channel)
    # b_ref: (1, 1)   conv bias
    x = x_ref[...]                                                   # (C, TL)
    logit = jnp.sum(x * w_ref[...], axis=0, keepdims=True) + b_ref[...]  # (1, TL)
    gate = jax.nn.sigmoid(logit)                                     # (1, TL)
    o_ref[...] = x * gate                                            # (C, TL)


def _lane_tile(m, c):
    """Lane tile: multiple of 128, >=2 grid steps when possible, VMEM-safe."""
    m128 = pl.cdiv(m, 128) * 128
    # keep one (C, TL) f32 buffer <= ~2 MiB so in/out double-buffers fit easily
    cap = max(128, min(2048, ((2 * 1024 * 1024) // max(1, 4 * c)) // 128 * 128))
    if m128 <= 128:
        return 128
    if m128 <= 2 * cap:
        # split roughly in two so v7x megacore has two parallel steps
        return min(cap, pl.cdiv(m128 // 2, 128) * 128)
    return cap


# --------------------------------- wrapper -----------------------------------

def sse_forward(x_nchw, w, b):
    """x: (N, C, H, W); w: (1, C, 1, 1); b: (1,).  Returns x * sigmoid(conv1x1(x))."""
    n, c, h, wd = x_nchw.shape
    m = n * h * wd

    # channels -> sublanes, pixels -> lanes (lane-dense layout)
    xcm = jnp.transpose(x_nchw, (1, 0, 2, 3)).reshape(c, m).astype(jnp.float32)

    tl = _lane_tile(m, c)
    m_pad = pl.cdiv(m, tl) * tl
    if m_pad != m:
        xcm = jnp.pad(xcm, ((0, 0), (0, m_pad - m)))

    w_col = w.reshape(c, 1).astype(jnp.float32)
    b_sc = b.reshape(1, 1).astype(jnp.float32)

    grid = (m_pad // tl,)
    y = pl.pallas_call(
        _sse_kernel,
        out_shape=jax.ShapeDtypeStruct((c, m_pad), jnp.float32),
        grid=grid,
        in_specs=[
            pl.BlockSpec((c, tl), lambda i: (0, i)),
            pl.BlockSpec((c, 1), lambda i: (0, 0)),
            pl.BlockSpec((1, 1), lambda i: (0, 0)),
        ],
        out_specs=pl.BlockSpec((c, tl), lambda i: (0, i)),
        compiler_params=pltpu.CompilerParams(
            dimension_semantics=("parallel",)),
    )(xcm, w_col, b_sc)

    y = y[:, :m].reshape(c, n, h, wd)
    return jnp.transpose(y, (1, 0, 2, 3)).astype(x_nchw.dtype)


# ----------------------------------- main -------------------------------------

if __name__ == "__main__":
    key = jax.random.PRNGKey(0)
    k_x, k_w, k_b = jax.random.split(key, 3)

    N, C, H, W = 2, 4, 16, 16
    x = jax.random.normal(k_x, (N, C, H, W), jnp.float32)          # NCHW like PyTorch
    w = jax.random.normal(k_w, (1, C, 1, 1), jnp.float32) * (C ** -0.5)
    b = 0.1 * jax.random.normal(k_b, (1,), jnp.float32)

    fwd = jax.jit(sse_forward)
    out = fwd(x, w, b)
    jax.block_until_ready(out)

    # pure-JAX reference (same semantics as the PyTorch module)
    logit = jnp.einsum("nchw,c->nhw", x, w.reshape(C)) + b[0]
    ref = x * jax.nn.sigmoid(logit)[:, None, :, :]

    assert out.shape == (N, C, H, W), out.shape
    assert bool(jnp.allclose(out, ref, atol=1e-4, rtol=1e-4))
    print("KERNEL_OK")
</pallas_src>

<mosaic_0001>
module attributes {stable_mosaic.version = 11 : i64} {
  func.func @_sse_kernel(%arg0: i32, %arg1: memref<4x256xf32, #tpu.memory_space<vmem>>, %arg2: memref<4x1xf32, #tpu.memory_space<vmem>>, %arg3: memref<1x1xf32, #tpu.memory_space<vmem>>, %arg4: memref<4x256xf32, #tpu.memory_space<vmem>>) attributes {dimension_semantics = [#tpu.dimension_semantics<parallel>], iteration_bounds = array<i64: 2>, scalar_prefetch = 0 : i64, scratch_operands = 0 : i64, tpu.core_type = #tpu.core_type<tc>, window_params = [{transform_indices = @transform_0, window_bounds = array<i64: 4, 256>}, {pipeline_mode = #tpu.pipeline_mode<synchronous>, transform_indices = @transform_1, window_bounds = array<i64: 4, 1>}, {pipeline_mode = #tpu.pipeline_mode<synchronous>, transform_indices = @transform_2, window_bounds = array<i64: 1, 1>}, {transform_indices = @transform_3, window_bounds = array<i64: 4, 256>}]} {
    %c0 = arith.constant 0 : index
    %c0_0 = arith.constant 0 : index
    %0 = vector.load %arg1[%c0, %c0_0] : memref<4x256xf32, #tpu.memory_space<vmem>>, vector<4x256xf32>
    %c0_1 = arith.constant 0 : index
    %c0_2 = arith.constant 0 : index
    %1 = vector.load %arg2[%c0_1, %c0_2] : memref<4x1xf32, #tpu.memory_space<vmem>>, vector<4x1xf32>
    %2 = vector.broadcast %1 : vector<4x1xf32> to vector<4x256xf32>
    %3 = arith.mulf %0, %2 : vector<4x256xf32>
    %cst = arith.constant dense<0.000000e+00> : vector<256xf32>
    %4 = vector.multi_reduction <add>, %3, %cst [0] : vector<4x256xf32> to vector<256xf32>
    %5 = vector.shape_cast %4 : vector<256xf32> to vector<1x256xf32>
    %c0_3 = arith.constant 0 : index
    %c0_4 = arith.constant 0 : index
    %6 = vector.load %arg3[%c0_3, %c0_4] : memref<1x1xf32, #tpu.memory_space<vmem>>, vector<1x1xf32>
    %7 = vector.broadcast %6 : vector<1x1xf32> to vector<1x256xf32>
    %8 = arith.addf %5, %7 : vector<1x256xf32>
    %9 = arith.negf %8 : vector<1x256xf32>
    %10 = math.exp %9 : vector<1x256xf32>
    %cst_5 = arith.constant 1.000000e+00 : f32
    %11 = vector.broadcast %cst_5 : f32 to vector<1x256xf32>
    %12 = arith.addf %11, %10 : vector<1x256xf32>
    %13 = arith.divf %11, %12 : vector<1x256xf32>
    %14 = vector.broadcast %13 : vector<1x256xf32> to vector<4x256xf32>
    %15 = arith.mulf %0, %14 : vector<4x256xf32>
    %c0_6 = arith.constant 0 : index
    %c0_7 = arith.constant 0 : index
    %16 = vector.load %arg4[%c0_6, %c0_7] : memref<4x256xf32, #tpu.memory_space<vmem>>, vector<4x256xf32>
    tpu.vector_store %arg4[%c0_6, %c0_7], %15 {strides = array<i32>} : memref<4x256xf32, #tpu.memory_space<vmem>>, vector<4x256xf32>,
    return
  }
  func.func @transform_0(%arg0: i32) -> (i32, i32) {
    %c0_i32 = arith.constant 0 : i32
    %c0_i32_0 = arith.constant 0 : i32
    return %c0_i32, %arg0 : i32, i32
  }
  func.func @transform_1(%arg0: i32) -> (i32, i32) {
    %c0_i32 = arith.constant 0 : i32
    %c0_i32_0 = arith.constant 0 : i32
    %c0_i32_1 = arith.constant 0 : i32
    return %c0_i32, %c0_i32_0 : i32, i32
  }
  func.func @transform_2(%arg0: i32) -> (i32, i32) {
    %c0_i32 = arith.constant 0 : i32
    %c0_i32_0 = arith.constant 0 : i32
    %c0_i32_1 = arith.constant 0 : i32
    return %c0_i32, %c0_i32_0 : i32, i32
  }
  func.func @transform_3(%arg0: i32) -> (i32, i32) {
    %c0_i32 = arith.constant 0 : i32
    %c0_i32_0 = arith.constant 0 : i32
    return %c0_i32, %arg0 : i32, i32
  }
}

</mosaic_0001>

<bundles_post_ra>
// kernel: sse_forward.1
= control target key start
LH: loop header
LB: loop body
LE: loop exit
PB: predicated region body
PF: predicated region fallthrough
CT: control target
= control target key end

     0   :  { %s360_s14 = smov 0   ;;  %s387_s0 = inlined_call_operand.vmem [shape: f32[4,512], index: 0, kind: input, shape index: {}]   ;;  %s388_s1 = inlined_call_operand.vmem [shape: f32[4,1], index: 1, kind: input, shape index: {}]   ;;  %s389_s2 = inlined_call_operand.<no memory space> [shape: f32[1,1], index: 2, kind: input, shape index: {}]   ;;  %s390_s3 = inlined_call_operand.vmem [shape: f32[4,512], index: 3, kind: output, shape index: {}]  }
   0x1   :  { %v8_v0 = vstv %s389_s2 }
   0x2   :  { %9 = vst [vmem:[#allocation2] sm:$0x1] %v8_v0 }
   0x3 LB: > { %s295_s15 = sadd.s32 4294967295, %s333_s14   ;;  %p299_p0 = scmp.ge.s32.totalorder %s333_s14, 1  ;;  %s333_s14 = sphi %s360_s14, %s15_s14  }
   0x4   : > { %p140_p1 = scmp.lt.s32.totalorder %s333_s14, 3 }
   0x6   : > { %p141_p2 = pnand %p299_p0, %p140_p1 }
   0x7   : > { %v177_v1 = vld [vmem:[%s388_s1] sm:$0xf] (!%p141_p2)  ;;  %v335_v2 = vmov (!%p141_p2), 0   ;;  %s300_s2 = sshll.u32 (!%p141_p2), %s295_s15, 1  ;;  %v336_v4 = vmov (!%p141_p2), 839922192   ;;  %v185_v6 = vlaneseq (!%p141_p2) }
   0x8   : > { %144 = sbr.rel (%p141_p2) target bundleno = 189 (0xbd), region = 32  ;;  %318 = vset.pattern.permute.xlu0 (!%p141_p2), %v335_v2  ;;  %p165_p3 = scmp.lt.s32.totalorder (!%p141_p2), %s300_s2, 3  ;;  %v183_v5 = vunpack.c.l.s4 (!%p141_p2), %v336_v4  ;;  %vm194_vm0 = vcmask (!%p141_p2), 1043456  }
   0x9   : > { %180 = vperm.xlu0 (!%p141_p2), %318, %v177_v1   ;;  %v209_v3 = vld [vmem:[#allocation2] sm:$0x1] (!%p141_p2)  ;;  %v186_v8 = vshrl.u32 (!%p141_p2), %v185_v6, 7 }
   0xa   : > { %v184_v7 = vunpack.c.0.s8 (!%p141_p2), %v183_v5 }
   0xb   : > { %v217_v22 = vsub.s32 (!%p141_p2), 0, %v186_v8 }
   0xc   : > { %v187_v9 = vsub.s32 (!%p141_p2), %v184_v7, %v186_v8 }
   0xd   : > { %212 = vperm.xlu0 (!%p141_p2), %318, %v209_v3  }
   0xf   : > { %s392_s2 = smov (!%p165_p3, %s300_s2), 3 }
  0x10   : > { %s301_s18 = sshll.u32 %s392_s2, 2 }
  0x11   : > { %s168_s21 = scalar_lea.vmem %s387_s0, %s301_s18  ;;  %s174_s24 = scalar_lea.vmem %s390_s3, %s301_s18 }
  0x12   : > { %v176_v11 = vld [vmem:[%s168_s21] sm:$0xff] }
  0x88   : > { %v181_v10 = vpop.permute.xlu0 %180 }
  0x89   : > { %v188_v12 = vrot.slane %v181_v10, %v187_v9 }
  0x8b   : > { %v190_v13 = vmul.f32 %v188_v12, %v176_v11 }
  0x8c   : > { %v213_v25 = vpop.permute.xlu0 %212 }
  0x8d   : > { %v192_v14 = vcombine.high %v190_v13, %v190_v13  ;;  %v195_v15 = vsel %vm194_vm0, %v190_v13, 0.0  ;;  %v218_v30 = vrot.slane %v213_v25, %v217_v22 }
  0x8e   : > { %v196_v16 = vrot.slane %v195_v15, 4 }
  0x8f   : > { %v202_v17 = vsel %vm194_vm0, %v192_v14, 0.0 }
  0x90   : > { %v197_v18 = vadd.f32 %v196_v16, %v195_v15  ;;  %v203_v19 = vrot.slane %v202_v17, 4 }
  0x92   : > { %v198_v20 = vrot.slane %v197_v18, 2  ;;  %v204_v21 = vadd.f32 %v203_v19, %v202_v17 }
  0x94   : > { %v199_v23 = vadd.f32 %v198_v20, %v197_v18  ;;  %v205_v24 = vrot.slane %v204_v21, 2 }
  0x96   : > { %v200_v26 = vrot.slane %v199_v23, 1  ;;  %v206_v27 = vadd.f32 %v205_v24, %v204_v21 }
  0x98   : > { %v201_v28 = vadd.f32 %v200_v26, %v199_v23  ;;  %v207_v29 = vrot.slane %v206_v27, 1 }
  0x9a   : > { %v208_v31 = vadd.f32 %v207_v29, %v206_v27  ;;  %v219_v32 = vadd.f32 %v218_v30, %v201_v28 }
  0x9c   : > { %v220_v33 = vadd.f32 %v218_v30, %v208_v31  ;;  %v304_v34 = vmul.f32 -1.442695, %v219_v32 }
  0x9e   : > { %319 = vpow2.f32 %v304_v34  ;;  %v305_v35 = vmul.f32 -1.442695, %v220_v33 }
  0xa0   : > { %321 = vpow2.f32 %v305_v35 }
  0xa8   : > { %v320_v36 = vpop.eup %319 }
  0xa9   : > { %v227_v37 = vadd.f32 1.0, %v320_v36 }
  0xaa   : > { %v322_v38 = vpop.eup %321 }
  0xab   : > { %v228_v39 = vadd.f32 1.0, %v322_v38  ;;  %323 = vrcp.f32 %v227_v37 }
  0xad   : > { %325 = vrcp.f32 %v228_v39 }
  0xb5   : > { %v324_v40 = vpop.eup %323 }
  0xb7   : > { %v326_v41 = vpop.eup %325 }
  0xb8   : > { %v235_v42 = vcombine.low %v324_v40, %v326_v41 }
  0xba   : > { %v237_v43 = vmul.f32 %v235_v42, %v176_v11 }
  0xbc   : > { %238 = vst [vmem:[%s174_s24] sm:$0xff] %v237_v43 }
  0xbd PF: > { %s15_s14 = sadd.s32 1, %s333_s14  }
  0xbe   : > { %p12_p4 = scmp.ge.s32.totalorder %s15_s14, 4  }
  0xc0   :  { %14 = sbr.rel (!%p12_p4) target bundleno = 3 (0x3), region = 62 }

</bundles_post_ra>
